<compile_context>
chip_gen: v6e
topology: v6e:2x2x1
jax: 0.10.0
libtpu: 0.0.40
codegen_flags: <defaults>
</compile_context>

<pallas_src>
import functools

import numpy as np
import jax
import jax.numpy as jnp
from jax.experimental import pallas as pl
from jax.experimental.pallas import tpu as pltpu


# ----------------------------- model config -----------------------------------
BATCH = 2
MAX_SEQ_LEN = 16          # seq_len == max_seq_len, as the PyTorch module assumes
EMBED_DIM = 32
NUM_FILTERS = 16
FILTERS = (2, 3, 4)
N_CLASS = 4
VOCAB_SIZE = 50

K_MAX = max(FILTERS)                    # 4 im2col taps
BL = BATCH * MAX_SEQ_LEN                # 32 flattened (batch, time) rows
LANES = 128                             # lane-dense feature / class width
VOCAB_PAD = 64                          # vocab padded for the one-hot matmul K dim
FC_OFF = K_MAX * VOCAB_PAD              # row offset of the FC weight in the slab
NEG = -1e30                             # finite "-inf" (avoids inf*0 NaNs)


def _softplus(x):
    # matches torch.nn.functional.softplus (beta=1, threshold=20); reference only
    return jnp.where(x > 20.0, x, jnp.log1p(jnp.exp(jnp.minimum(x, 20.0))))


# ------------------------------- Pallas kernel ---------------------------------
def textcnn_kernel(ids_ref, w_ref, b_ref, out_ref, *, batch, seq_len):
    """ids_ref: (B*L, K_MAX) int32 -- column t = token id at (row + t) (rows whose
                window wraps a sample/array boundary are masked out below)
       w_ref:   (K_MAX*VOCAB_PAD + 128, 128) bf16 slab:
                  rows [t*64,(t+1)*64): emb @ W_t (3 filter banks packed along N)
                  rows [256, 384):      zero-padded FC weight
       b_ref:   (2, 128) f32: row 0 conv bias, row 1 FC bias (NEG on pad lanes)
       out_ref: (B, 128) f32 log-probs (first N_CLASS lanes valid)"""
    bl = batch * seq_len

    # ---- embedding gather + all Conv1d banks fused on the MXU ------------------
    # one_hot(ids[:, t]) @ (emb @ W_t): selecting a row of the folded table IS the
    # embedding lookup times the tap-t filter slice; accumulate over taps in f32.
    viota = jax.lax.broadcasted_iota(jnp.int32, (bl, VOCAB_PAD), 1)
    ids = ids_ref[...]                                              # (BL, K_MAX)
    acc = jnp.zeros((bl, LANES), jnp.float32)
    for t in range(K_MAX):
        onehot = (ids[:, t:t + 1] == viota).astype(jnp.bfloat16)    # (BL, 64)
        acc = acc + jnp.dot(onehot,
                            w_ref[t * VOCAB_PAD:(t + 1) * VOCAB_PAD, :],
                            preferred_element_type=jnp.float32)
    acc = acc + b_ref[0:1, :]

    # ---- Mish: x * tanh(softplus(x)) = x * ((1+e^x)^2 - 1) / ((1+e^x)^2 + 1) ---
    p = 1.0 + jnp.exp(jnp.minimum(acc, 20.0))
    p2 = p * p
    tsp = (p2 - 1.0) * pl.reciprocal(p2 + 1.0, approx=True)
    act = acc * jnp.where(acc > 20.0, 1.0, tsp)   # softplus(x)~x, tanh(x)~1, x>20

    # ---- in-kernel boundary mask + per-sample global max-pool ------------------
    # windows with pos > L - k (per filter bank) read across a sample boundary /
    # wrapped ids; kill them before pooling. Padded feature lanes stay at 0.
    row = jax.lax.broadcasted_iota(jnp.int32, (bl, LANES), 0)
    lane = jax.lax.broadcasted_iota(jnp.int32, (bl, LANES), 1)
    pos = row & (seq_len - 1) if (seq_len & (seq_len - 1)) == 0 else row % seq_len
    thresh = jnp.full((bl, LANES), seq_len - 1, jnp.int32)   # pad lanes: keep all
    for j, k in enumerate(FILTERS):
        in_bank = (lane >= j * NUM_FILTERS) & (lane < (j + 1) * NUM_FILTERS)
        thresh = jnp.where(in_bank, seq_len - k, thresh)
    act = jnp.where(pos <= thresh, act, NEG)
    feat = jnp.max(act.reshape(batch, seq_len, LANES), axis=1)       # (B, 128)

    # ---- dropout(p=0.15) is identity in eval mode; FC + log_softmax ------------
    logits = jnp.dot(feat.astype(jnp.bfloat16), w_ref[FC_OFF:FC_OFF + LANES, :],
                     preferred_element_type=jnp.float32) + b_ref[1:2, :]
    m = jnp.max(logits, axis=-1, keepdims=True)
    lse = m + jnp.log(jnp.sum(jnp.exp(logits - m), axis=-1, keepdims=True))
    out_ref[...] = logits - lse                                      # lane-dense store


# ------------------------------- weight packing ---------------------------------
def pack_params(params):
    """Fold the embedding table into the conv filters and pack all constants into
       two lane-dense slabs (one bf16 weight slab, one f32 bias slab)."""
    emb_table, conv_params, fc_w, fc_b = params
    nf = NUM_FILTERS

    emb_pad = np.zeros((VOCAB_PAD, EMBED_DIM), np.float32)
    emb_pad[:VOCAB_SIZE] = np.asarray(emb_table)

    wslab = np.zeros((FC_OFF + LANES, LANES), np.float32)
    bslab = np.zeros((2, LANES), np.float32)
    for j, ((w, b), k) in enumerate(zip(conv_params, FILTERS)):
        w = np.asarray(w)                                  # (k, E, F)
        for t in range(k):                                 # taps t >= k stay zero
            wslab[t * VOCAB_PAD:(t + 1) * VOCAB_PAD,
                  j * nf:(j + 1) * nf] = emb_pad @ w[t]    # folded emb @ W_t
        bslab[0, j * nf:(j + 1) * nf] = np.asarray(b)[0]

    wslab[FC_OFF:FC_OFF + len(FILTERS) * nf, :N_CLASS] = np.asarray(fc_w)
    bslab[1, :] = NEG                                      # padded class lanes
    bslab[1, :N_CLASS] = np.asarray(fc_b)[0]

    return dict(w=jnp.asarray(wslab, jnp.bfloat16),
                b=jnp.asarray(bslab, jnp.float32))


# ------------------------------- wrapper ----------------------------------------
@jax.jit
def textcnn_forward(in_ids, packed):
    # Only remaining host-side glue: shift the token IDS (not activations) for the
    # K_MAX im2col taps -- 512 B of int32.  Rows whose window wraps past a sample
    # (or the array end) are exactly the ones killed by the in-kernel mask.
    ids = in_ids.reshape(BL).astype(jnp.int32)
    ids_taps = jnp.stack([jnp.roll(ids, -t) for t in range(K_MAX)], axis=1)

    kernel = functools.partial(textcnn_kernel, batch=BATCH, seq_len=MAX_SEQ_LEN)
    vmem = pl.BlockSpec(memory_space=pltpu.MemorySpace.VMEM)
    out = pl.pallas_call(
        kernel,
        out_shape=jax.ShapeDtypeStruct((BATCH, LANES), jnp.float32),
        in_specs=[vmem, vmem, vmem],
        out_specs=vmem,
    )(ids_taps, packed["w"], packed["b"])
    return out[:, :N_CLASS]


# ------------------------------- reference (plain JAX, f32) ----------------------
def textcnn_reference(in_ids, params):
    emb_table, conv_params, fc_w, fc_b = params
    x = emb_table[in_ids].astype(jnp.float32)              # (B, L, E)
    pooled = []
    for (w, bias), k in zip(conv_params, FILTERS):
        l_out = x.shape[1] - k + 1
        acc = jnp.zeros((x.shape[0], l_out, w.shape[-1]), jnp.float32)
        for t in range(k):
            acc = acc + jnp.einsum('ble,ef->blf', x[:, t:t + l_out, :], w[t])
        acc = acc + bias[None]
        act = acc * jnp.tanh(_softplus(acc))
        pooled.append(jnp.max(act, axis=1))
    feat = jnp.concatenate(pooled, axis=-1)
    logits = feat @ fc_w + fc_b
    return jax.nn.log_softmax(logits, axis=-1)


# ------------------------------- params -----------------------------------------
def init_params(key):
    keys = jax.random.split(key, 2 + 2 * len(FILTERS) + 2)
    emb_table = jax.random.normal(keys[0], (VOCAB_SIZE, EMBED_DIM), jnp.float32)
    conv_params = []
    for i, k in enumerate(FILTERS):
        w = 0.1 * jax.random.normal(keys[1 + 2 * i], (k, EMBED_DIM, NUM_FILTERS),
                                    jnp.float32)
        b = 0.1 * jax.random.normal(keys[2 + 2 * i], (1, NUM_FILTERS), jnp.float32)
        conv_params.append((w, b))
    fc_w = 0.1 * jax.random.normal(keys[-2],
                                   (len(FILTERS) * NUM_FILTERS, N_CLASS), jnp.float32)
    fc_b = 0.1 * jax.random.normal(keys[-1], (1, N_CLASS), jnp.float32)
    return emb_table, conv_params, fc_w, fc_b


# ------------------------------- main --------------------------------------------
if __name__ == "__main__":
    key = jax.random.PRNGKey(0)
    pkey, dkey = jax.random.split(key)
    params = init_params(pkey)
    packed = pack_params(params)

    in_ids = jax.random.randint(dkey, (BATCH, MAX_SEQ_LEN), 0, VOCAB_SIZE,
                                dtype=jnp.int32)

    out = jax.block_until_ready(textcnn_forward(in_ids, packed))
    ref = jax.block_until_ready(textcnn_reference(in_ids, params))

    assert out.shape == (BATCH, N_CLASS)
    # bf16 MXU operands + approx reciprocal in Mish -> loosened tolerance vs f32 ref
    assert jnp.allclose(out, ref, atol=5e-2, rtol=5e-2), (out, ref)
    # log-probs should exponentiate-sum to 1
    assert jnp.allclose(jnp.sum(jnp.exp(out), axis=-1), 1.0, atol=1e-3)

    # TODO(synk): dropout is implemented as eval-mode identity (no RNG mask);
    # the B==1 `.squeeze()` edge case of the PyTorch code is not reproduced.
    print("KERNEL_OK")
</pallas_src>

<mosaic_0001>
module attributes {stable_mosaic.version = 11 : i64} {
  func.func @textcnn_kernel(%arg0: memref<32x4xi32, #tpu.memory_space<vmem>>, %arg1: memref<384x128xbf16, #tpu.memory_space<vmem>>, %arg2: memref<2x128xf32, #tpu.memory_space<vmem>>, %arg3: memref<2x128xf32, #tpu.memory_space<vmem>>) attributes {dimension_semantics = [], scalar_prefetch = 0 : i64, scratch_operands = 0 : i64, tpu.core_type = #tpu.core_type<tc>} {
    %0 = tpu.iota {dimensions = array<i32: 1>} : vector<32x64xi32>
    %c0 = arith.constant 0 : index
    %c0_0 = arith.constant 0 : index
    %1 = vector.load %arg0[%c0, %c0_0] : memref<32x4xi32, #tpu.memory_space<vmem>>, vector<32x4xi32>
    %cst = arith.constant 0.000000e+00 : f32
    %2 = vector.broadcast %cst : f32 to vector<32x128xf32>
    %3 = vector.extract_strided_slice %1 {offsets = [0, 0], sizes = [32, 1], strides = [1, 1]} : vector<32x4xi32> to vector<32x1xi32>
    %4 = vector.broadcast %3 : vector<32x1xi32> to vector<32x64xi32>
    %5 = arith.cmpi eq, %4, %0 : vector<32x64xi32>
    %6 = arith.extui %5 : vector<32x64xi1> to vector<32x64xi32>
    %7 = arith.sitofp %6 : vector<32x64xi32> to vector<32x64xf32>
    %8 = arith.truncf %7 : vector<32x64xf32> to vector<32x64xbf16>
    %c0_1 = arith.constant 0 : index
    %c0_2 = arith.constant 0 : index
    %9 = vector.load %arg1[%c0_1, %c0_2] : memref<384x128xbf16, #tpu.memory_space<vmem>>, vector<64x128xbf16>
    %cst_3 = arith.constant dense<0.000000e+00> : vector<32x128xf32>
    %10 = tpu.matmul %8, %9, %cst_3 {dimension_numbers = #tpu.dot_dimension_numbers<[1], [0], [0], [1], [0, 0, 1, 1], [], []>} : vector<32x64xbf16>, vector<64x128xbf16>, vector<32x128xf32> -> vector<32x128xf32>
    %11 = arith.addf %2, %10 : vector<32x128xf32>
    %12 = vector.extract_strided_slice %1 {offsets = [0, 1], sizes = [32, 1], strides = [1, 1]} : vector<32x4xi32> to vector<32x1xi32>
    %13 = vector.broadcast %12 : vector<32x1xi32> to vector<32x64xi32>
    %14 = arith.cmpi eq, %13, %0 : vector<32x64xi32>
    %15 = arith.extui %14 : vector<32x64xi1> to vector<32x64xi32>
    %16 = arith.sitofp %15 : vector<32x64xi32> to vector<32x64xf32>
    %17 = arith.truncf %16 : vector<32x64xf32> to vector<32x64xbf16>
    %c64 = arith.constant 64 : index
    %c0_4 = arith.constant 0 : index
    %18 = vector.load %arg1[%c64, %c0_4] : memref<384x128xbf16, #tpu.memory_space<vmem>>, vector<64x128xbf16>
    %cst_5 = arith.constant dense<0.000000e+00> : vector<32x128xf32>
    %19 = tpu.matmul %17, %18, %cst_5 {dimension_numbers = #tpu.dot_dimension_numbers<[1], [0], [0], [1], [0, 0, 1, 1], [], []>} : vector<32x64xbf16>, vector<64x128xbf16>, vector<32x128xf32> -> vector<32x128xf32>
    %20 = arith.addf %11, %19 : vector<32x128xf32>
    %21 = vector.extract_strided_slice %1 {offsets = [0, 2], sizes = [32, 1], strides = [1, 1]} : vector<32x4xi32> to vector<32x1xi32>
    %22 = vector.broadcast %21 : vector<32x1xi32> to vector<32x64xi32>
    %23 = arith.cmpi eq, %22, %0 : vector<32x64xi32>
    %24 = arith.extui %23 : vector<32x64xi1> to vector<32x64xi32>
    %25 = arith.sitofp %24 : vector<32x64xi32> to vector<32x64xf32>
    %26 = arith.truncf %25 : vector<32x64xf32> to vector<32x64xbf16>
    %c128 = arith.constant 128 : index
    %c0_6 = arith.constant 0 : index
    %27 = vector.load %arg1[%c128, %c0_6] : memref<384x128xbf16, #tpu.memory_space<vmem>>, vector<64x128xbf16>
    %cst_7 = arith.constant dense<0.000000e+00> : vector<32x128xf32>
    %28 = tpu.matmul %26, %27, %cst_7 {dimension_numbers = #tpu.dot_dimension_numbers<[1], [0], [0], [1], [0, 0, 1, 1], [], []>} : vector<32x64xbf16>, vector<64x128xbf16>, vector<32x128xf32> -> vector<32x128xf32>
    %29 = arith.addf %20, %28 : vector<32x128xf32>
    %30 = vector.extract_strided_slice %1 {offsets = [0, 3], sizes = [32, 1], strides = [1, 1]} : vector<32x4xi32> to vector<32x1xi32>
    %31 = vector.broadcast %30 : vector<32x1xi32> to vector<32x64xi32>
    %32 = arith.cmpi eq, %31, %0 : vector<32x64xi32>
    %33 = arith.extui %32 : vector<32x64xi1> to vector<32x64xi32>
    %34 = arith.sitofp %33 : vector<32x64xi32> to vector<32x64xf32>
    %35 = arith.truncf %34 : vector<32x64xf32> to vector<32x64xbf16>
    %c192 = arith.constant 192 : index
    %c0_8 = arith.constant 0 : index
    %36 = vector.load %arg1[%c192, %c0_8] : memref<384x128xbf16, #tpu.memory_space<vmem>>, vector<64x128xbf16>
    %cst_9 = arith.constant dense<0.000000e+00> : vector<32x128xf32>
    %37 = tpu.matmul %35, %36, %cst_9 {dimension_numbers = #tpu.dot_dimension_numbers<[1], [0], [0], [1], [0, 0, 1, 1], [], []>} : vector<32x64xbf16>, vector<64x128xbf16>, vector<32x128xf32> -> vector<32x128xf32>
    %38 = arith.addf %29, %37 : vector<32x128xf32>
    %c0_10 = arith.constant 0 : index
    %c0_11 = arith.constant 0 : index
    %39 = vector.load %arg2[%c0_10, %c0_11] : memref<2x128xf32, #tpu.memory_space<vmem>>, vector<1x128xf32>
    %40 = vector.broadcast %39 : vector<1x128xf32> to vector<32x128xf32>
    %41 = arith.addf %38, %40 : vector<32x128xf32>
    %cst_12 = arith.constant 2.000000e+01 : f32
    %42 = vector.broadcast %cst_12 : f32 to vector<32x128xf32>
    %43 = arith.minimumf %41, %42 : vector<32x128xf32>
    %44 = math.exp %43 : vector<32x128xf32>
    %cst_13 = arith.constant 1.000000e+00 : f32
    %45 = vector.broadcast %cst_13 : f32 to vector<32x128xf32>
    %46 = arith.addf %45, %44 : vector<32x128xf32>
    %47 = arith.mulf %46, %46 : vector<32x128xf32>
    %cst_14 = arith.constant 1.000000e+00 : f32
    %48 = vector.broadcast %cst_14 : f32 to vector<32x128xf32>
    %49 = arith.subf %47, %48 : vector<32x128xf32>
    %cst_15 = arith.constant 1.000000e+00 : f32
    %50 = vector.broadcast %cst_15 : f32 to vector<32x128xf32>
    %51 = arith.addf %47, %50 : vector<32x128xf32>
    %52 = tpu.reciprocal %51 {approx = true} : vector<32x128xf32> -> vector<32x128xf32>
    %53 = arith.mulf %49, %52 : vector<32x128xf32>
    %cst_16 = arith.constant 2.000000e+01 : f32
    %54 = vector.broadcast %cst_16 : f32 to vector<32x128xf32>
    %55 = arith.cmpf ogt, %41, %54 : vector<32x128xf32>
    %cst_17 = arith.constant 1.000000e+00 : f32
    %56 = vector.broadcast %cst_17 : f32 to vector<32x128xf32>
    %57 = arith.select %55, %56, %53 : vector<32x128xi1>, vector<32x128xf32>
    %58 = arith.mulf %41, %57 : vector<32x128xf32>
    %59 = tpu.iota {dimensions = array<i32: 0>} : vector<32x128xi32>
    %60 = tpu.iota {dimensions = array<i32: 1>} : vector<32x128xi32>
    %c15_i32 = arith.constant 15 : i32
    %61 = vector.broadcast %c15_i32 : i32 to vector<32x128xi32>
    %62 = arith.andi %59, %61 : vector<32x128xi32>
    %c15_i32_18 = arith.constant 15 : i32
    %63 = vector.broadcast %c15_i32_18 : i32 to vector<32x128xi32>
    %c0_i32 = arith.constant 0 : i32
    %64 = vector.broadcast %c0_i32 : i32 to vector<32x128xi32>
    %65 = arith.cmpi sge, %60, %64 : vector<32x128xi32>
    %c16_i32 = arith.constant 16 : i32
    %66 = vector.broadcast %c16_i32 : i32 to vector<32x128xi32>
    %67 = arith.cmpi slt, %60, %66 : vector<32x128xi32>
    %68 = arith.andi %65, %67 : vector<32x128xi1>
    %c14_i32 = arith.constant 14 : i32
    %69 = vector.broadcast %c14_i32 : i32 to vector<32x128xi32>
    %70 = arith.select %68, %69, %63 : vector<32x128xi1>, vector<32x128xi32>
    %c16_i32_19 = arith.constant 16 : i32
    %71 = vector.broadcast %c16_i32_19 : i32 to vector<32x128xi32>
    %72 = arith.cmpi sge, %60, %71 : vector<32x128xi32>
    %c32_i32 = arith.constant 32 : i32
    %73 = vector.broadcast %c32_i32 : i32 to vector<32x128xi32>
    %74 = arith.cmpi slt, %60, %73 : vector<32x128xi32>
    %75 = arith.andi %72, %74 : vector<32x128xi1>
    %c13_i32 = arith.constant 13 : i32
    %76 = vector.broadcast %c13_i32 : i32 to vector<32x128xi32>
    %77 = arith.select %75, %76, %70 : vector<32x128xi1>, vector<32x128xi32>
    %c32_i32_20 = arith.constant 32 : i32
    %78 = vector.broadcast %c32_i32_20 : i32 to vector<32x128xi32>
    %79 = arith.cmpi sge, %60, %78 : vector<32x128xi32>
    %c48_i32 = arith.constant 48 : i32
    %80 = vector.broadcast %c48_i32 : i32 to vector<32x128xi32>
    %81 = arith.cmpi slt, %60, %80 : vector<32x128xi32>
    %82 = arith.andi %79, %81 : vector<32x128xi1>
    %c12_i32 = arith.constant 12 : i32
    %83 = vector.broadcast %c12_i32 : i32 to vector<32x128xi32>
    %84 = arith.select %82, %83, %77 : vector<32x128xi1>, vector<32x128xi32>
    %85 = arith.cmpi sle, %62, %84 : vector<32x128xi32>
    %cst_21 = arith.constant -1.000000e+30 : f32
    %86 = vector.broadcast %cst_21 : f32 to vector<32x128xf32>
    %87 = arith.select %85, %58, %86 : vector<32x128xi1>, vector<32x128xf32>
    %88 = vector.shape_cast %87 : vector<32x128xf32> to vector<2x16x128xf32>
    %cst_22 = arith.constant dense<0xFF800000> : vector<2x128xf32>
    %89 = vector.multi_reduction <maximumf>, %88, %cst_22 [1] : vector<2x16x128xf32> to vector<2x128xf32>
    %90 = arith.truncf %89 : vector<2x128xf32> to vector<2x128xbf16>
    %c256 = arith.constant 256 : index
    %c0_23 = arith.constant 0 : index
    %91 = vector.load %arg1[%c256, %c0_23] : memref<384x128xbf16, #tpu.memory_space<vmem>>, vector<128x128xbf16>
    %cst_24 = arith.constant dense<0.000000e+00> : vector<2x128xf32>
    %92 = tpu.matmul %90, %91, %cst_24 {dimension_numbers = #tpu.dot_dimension_numbers<[1], [0], [0], [1], [0, 0, 1, 1], [], []>} : vector<2x128xbf16>, vector<128x128xbf16>, vector<2x128xf32> -> vector<2x128xf32>
    %c1 = arith.constant 1 : index
    %c0_25 = arith.constant 0 : index
    %93 = vector.load %arg2[%c1, %c0_25] : memref<2x128xf32, #tpu.memory_space<vmem>>, vector<1x128xf32>
    %94 = vector.broadcast %93 : vector<1x128xf32> to vector<2x128xf32>
    %95 = arith.addf %92, %94 : vector<2x128xf32>
    %cst_26 = arith.constant dense<0xFF800000> : vector<2xf32>
    %96 = vector.multi_reduction <maximumf>, %95, %cst_26 [1] : vector<2x128xf32> to vector<2xf32>
    %97 = vector.shape_cast %96 : vector<2xf32> to vector<2x1xf32>
    %98 = vector.broadcast %97 : vector<2x1xf32> to vector<2x128xf32>
    %99 = arith.subf %95, %98 : vector<2x128xf32>
    %100 = math.exp %99 : vector<2x128xf32>
    %cst_27 = arith.constant dense<0.000000e+00> : vector<2xf32>
    %101 = vector.multi_reduction <add>, %100, %cst_27 [1] : vector<2x128xf32> to vector<2xf32>
    %102 = vector.shape_cast %101 : vector<2xf32> to vector<2x1xf32>
    %103 = math.log %102 : vector<2x1xf32>
    %104 = arith.addf %97, %103 : vector<2x1xf32>
    %105 = vector.broadcast %104 : vector<2x1xf32> to vector<2x128xf32>
    %106 = arith.subf %95, %105 : vector<2x128xf32>
    %c0_28 = arith.constant 0 : index
    %c0_29 = arith.constant 0 : index
    %107 = vector.load %arg3[%c0_28, %c0_29] : memref<2x128xf32, #tpu.memory_space<vmem>>, vector<2x128xf32>
    tpu.vector_store %arg3[%c0_28, %c0_29], %106 {strides = array<i32>} : memref<2x128xf32, #tpu.memory_space<vmem>>, vector<2x128xf32>,
    return
  }
}

</mosaic_0001>

<bundles_post_ra>
// kernel: textcnn_forward.1
= control target key start
LH: loop header
LB: loop body
LE: loop exit
PB: predicated region body
PF: predicated region fallthrough
CT: control target
= control target key end

     0   :  { %8 = vsyncpa [#allocation3], 0  ;;  %s1147_s0 = inlined_call_operand.vmem [shape: s32[32,4], index: 0, kind: input, shape index: {}]   ;;  %s1148_s1 = inlined_call_operand.hbm [shape: bf16[384,128], index: 1, kind: input, shape index: {}]   ;;  %s1149_s2 = inlined_call_operand.vmem [shape: f32[2,128], index: 2, kind: input, shape index: {}]   ;;  %s1150_s3 = inlined_call_operand.hbm [shape: f32[2,128], index: 3, kind: output, shape index: {}]  }
   0x1   :  { %9 = vsyncpa [#allocation4], 0  ;;  %s1008_s12 = smov [#allocation2]  }
   0x2   :  { %s17_s13 = sshll.u32 %s1008_s12, 4  ;;  %s18_s13 = int_to_ptr.vmem [resolvable:$true] %s17_s13 }
   0x3   :  { %s972_s14 = scalar_lea.vmem %s18_s13, 3072  ;;  %p977_p1 = scmp.lt.s32.totalorder %s18_s13, %s18_s13 }
   0x4   :  { %p973_p0 = scmp.ne.s32.totalorder %s18_s13, %s972_s14  ;;  %p978_p2 = scmp.lt.s32.totalorder %s972_s14, %s972_s14 }
   0x6   :  { %p979_p3 = por %p978_p2, %p977_p1 }
   0x8   :  { %p980_p4 = pnand %p979_p3, %p973_p0 }
   0xa   :  { %983 = shalt.err (!%p980_p4)
}
   0xb   :  { %s1009_s15 = smov 64   ;;  %s1010_s16 = smov 4  }
   0xc   :  { %23 = dma.hbm_to_vmem [thread:$0]  %s1148_s1, 3072, %s18_s13, [#allocation3], %s1009_s15, %s1009_s15, %s1010_s16  }
   0xd   :  { %1004 = dma.done.wait [#allocation3], 3072  }
   0xe   :  { %1005 = vsyncadd [#allocation3], 4294964224  ;;  %v1011_v0 = vmov 1   ;;  %v34_v1 = vld [vmem:[%s1147_s0 + $0x10] sm:$0xff]  ;;  %v32_v2 = vld [vmem:[%s1147_s0] sm:$0xff]  ;;  %v1012_v8 = vmov 0   ;;  %v30_v18 = vlaneseq }
   0xf   :  { %913 = vset.pattern.permute.xlu1 %v1011_v0  ;;  %912 = vset.pattern.permute.xlu0 %v1011_v0  ;;  %v35_v3 = vld [vmem:[%s1147_s0 + $0x18] sm:$0xff]  ;;  %v33_v4 = vld [vmem:[%s1147_s0 + $0x8] sm:$0xff]  ;;  %v921_v6 = vld [vmem:[#allocation2 + $0x30] sm:$0xff]   ;;  %v1013_v13 = vmov 2   ;;  %v1014_v16 = vmov 3   ;;  %v1015_v17 = vmov 0.0  }
  0x10   :  { %77 = vperm.xlu1 %913, %v34_v1   ;;  %71 = vperm.xlu0 %912, %v32_v2   ;;  %v920_v5 = vld [vmem:[#allocation2 + $0x38] sm:$0xff]   ;;  %v922_v7 = vld [vmem:[#allocation2 + $0x28] sm:$0xff]   ;;  %v923_v10 = vld [vmem:[#allocation2 + $0x20] sm:$0xff]   ;;  %v1056_v19 = vand.u32 127, %v30_v18  ;;  %vm128_vm4 = vcmask 523264  }
  0x11   :  { %833 = vmatprep.subr.bf16.mxu1 %v920_v5  ;;  %v926_v9 = vld [vmem:[#allocation2 + $0x58] sm:$0xff]   ;;  %v928_v11 = vld [vmem:[#allocation2 + $0x50] sm:$0xff]   ;;  %v930_v14 = vld [vmem:[#allocation2 + $0x48] sm:$0xff]  }
  0x12   :  { %834 = vmatpush3.bf16.msra.mxu1 %v920_v5  ;;  %857 = vmatprep.subr.bf16.mxu0 %v926_v9  ;;  %v924_v12 = vld [vmem:[#allocation2 + $0x18] sm:$0xff]   ;;  %v932_v15 = vld [vmem:[#allocation2 + $0x40] sm:$0xff]   ;;  %v925_v30 = vld [vmem:[#allocation2 + $0x10] sm:$0xff]  }
  0x13   :  { %835 = vmatprep.subr.bf16.mxu1 %v921_v6  ;;  %858 = vmatpush3.bf16.msra.mxu0 %v926_v9  ;;  %v927_v36 = vld [vmem:[#allocation2 + $0x8] sm:$0xff]   ;;  %v929_v39 = vld [vmem:[#allocation2] sm:$0xff]   ;;  %v931_v44 = vld [vmem:[#allocation2 + $0x78] sm:$0xff]  }
  0x14   :  { %80 = vperm.xlu1 %913, %v35_v3   ;;  %74 = vperm.xlu0 %912, %v33_v4   ;;  %v933_v50 = vld [vmem:[#allocation2 + $0x70] sm:$0xff]   ;;  %v934_v55 = vld [vmem:[#allocation2 + $0x68] sm:$0xff]   ;;  %v935_v60 = vld [vmem:[#allocation2 + $0x60] sm:$0xff]  }
  0x15   :  { %859 = vmatprep.subr.bf16.mxu0 %v928_v11  ;;  %v938_v5 = vld [vmem:[#allocation2 + $0xa8] sm:$0xff]  }
  0x16   :  { %836 = vmatpush3.bf16.msra.mxu1 %v921_v6  ;;  %v939_v6 = vld [vmem:[#allocation2 + $0xa0] sm:$0xff]   ;;  %v942_v9 = vld [vmem:[#allocation2 + $0x88] sm:$0xff]  }
  0x17   :  { %837 = vmatprep.subr.bf16.mxu1 %v922_v7  ;;  %860 = vmatpush3.bf16.msra.mxu0 %v928_v11 }
  0x18   :  { %915 = vset.pattern.permute.xlu1 %v1012_v8  ;;  %914 = vset.pattern.permute.xlu0 %v1012_v8  ;;  %v941_v8 = vld [vmem:[#allocation2 + $0x90] sm:$0xff]  }
  0x19   :  { %40 = vperm.xlu1 %915, %v33_v4   ;;  %37 = vperm.xlu0 %914, %v32_v2  }
  0x1a   :  { %838 = vmatpush3.bf16.msra.mxu1 %v922_v7  ;;  %861 = vmatprep.subr.bf16.mxu0 %v930_v14  ;;  %v940_v7 = vld [vmem:[#allocation2 + $0x98] sm:$0xff]  }
  0x1b   :  { %839 = vmatprep.subr.bf16.mxu1 %v923_v10  ;;  %862 = vmatpush3.bf16.msra.mxu0 %v930_v14 }
  0x1c   :  { %863 = vmatprep.subr.bf16.mxu0 %v932_v15 }
  0x1d   :  { %43 = vperm.xlu1 %915, %v34_v1   ;;  %46 = vperm.xlu0 %914, %v35_v3  }
  0x1e   :  { %840 = vmatpush3.bf16.msra.mxu1 %v923_v10  ;;  %v943_v10 = vld [vmem:[#allocation2 + $0x80] sm:$0xff]  }
  0x1f   :  { %845 = vmatprep.subr.bf16.mxu1 %v924_v12  ;;  %864 = vmatpush3.bf16.msra.mxu0 %v932_v15 }
  0x20   :  { %881 = vmatprep.subr.bf16.mxu0 %v1015_v17 }
  0x21   :  { %916 = vset.pattern.permute.xlu1 %v1013_v13  ;;  %917 = vset.pattern.permute.xlu0 %v1013_v13 }
  0x22   :  { %264 = vperm.xlu1 %916, %v32_v2   ;;  %267 = vperm.xlu0 %917, %v33_v4  }
  0x26   :  { %270 = vperm.xlu1 %916, %v34_v1   ;;  %918 = vset.pattern.permute.xlu0 %v1014_v16 }
  0x27   :  { %381 = vperm.xlu0 %918, %v32_v2  }
  0x2a   :  { %273 = vperm.xlu1 %916, %v35_v3  }
  0x2b   :  { %390 = vperm.xlu0 %918, %v35_v3   ;;  %v936_v3 = vld [vmem:[#allocation2 + $0xb8] sm:$0xff]  }
  0x2e   :  { %919 = vset.pattern.permute.xlu1 %v1014_v16 }
  0x2f   :  { %384 = vperm.xlu1 %919, %v33_v4   ;;  %v937_v4 = vld [vmem:[#allocation2 + $0xb0] sm:$0xff]  }
  0x33   :  { %387 = vperm.xlu1 %919, %v34_v1  }
  0x8b   :  { %v78_v20 = vpop.permute.xlu1 %77  ;;  %v72_v21 = vpop.permute.xlu0 %71 }
  0x8c   :  { %vm84_vm0 = vcmp.eq.s32.totalorder %v78_v20, %v1056_v19  ;;  %vm82_vm1 = vcmp.eq.s32.totalorder %v72_v21, %v1056_v19 }
  0x8d   :  { %v752_v24 = vsel %vm84_vm0, 1.0, %v1015_v17  ;;  %v750_v25 = vsel %vm82_vm1, 1.0, %v1015_v17  ;;  %vm1016_vm1 = vmmov 0  }
  0x8f   :  { %v81_v22 = vpop.permute.xlu1 %80  ;;  %v75_v23 = vpop.permute.xlu0 %74 }
  0x90   :  { %vm85_vm2 = vcmp.eq.s32.totalorder %v81_v22, %v1056_v19  ;;  %vm83_vm3 = vcmp.eq.s32.totalorder %v75_v23, %v1056_v19 }
  0x91   :  { %v753_v26 = vsel %vm85_vm2, 1.0, %v1015_v17  ;;  %v751_v27 = vsel %vm83_vm3, 1.0, %v1015_v17  ;;  %vm564_vm2 = vcmp.lt.s32.totalorder %v1056_v19, 16  ;;  %vm567_vm3 = vcmp.ge.s32.totalorder %v1056_v19, 16 }
  0x92   :  { %v95_v28 = vpack.c.bf16 %v753_v26, %v752_v24  ;;  %v94_v29 = vpack.c.bf16 %v751_v27, %v750_v25 }
  0x94   :  { %v41_v31 = vpop.permute.xlu1 %40  ;;  %841 = vmatprep.mubr.msk.bf16.mxu1 %vm128_vm4, %v94_v29  ;;  %v38_v32 = vpop.permute.xlu0 %37 }
  0x95   :  { %vm49_vm5 = vcmp.eq.s32.totalorder %v41_v31, %v1056_v19  ;;  %vm48_vm6 = vcmp.eq.s32.totalorder %v38_v32, %v1056_v19  ;;  %842 = vmatmul.mubr.msk.bf16.vlgmr.msra.gmra.mxu1 %vm128_vm4, %v95_v28 }
  0x96   :  { %v747_v33 = vsel %vm49_vm5, 1.0, %v1015_v17  ;;  %v746_v34 = vsel %vm48_vm6, 1.0, %v1015_v17  ;;  %846 = vmatpush3.bf16.msra.mxu1 %v924_v12  ;;  %vm571_vm6 = vcmp.ge.s32.totalorder %v1056_v19, 32 }
  0x97   :  { %v60_v35 = vpack.c.bf16 %v747_v33, %v746_v34  ;;  %847 = vmatprep.subr.bf16.mxu1 %v925_v30 }
  0x98   :  { %v44_v37 = vpop.permute.xlu1 %43  ;;  %v47_v38 = vpop.permute.xlu0 %46 }
  0x99   :  { %853 = vmatprep.mubr.msk.bf16.mxu1 %vm128_vm4, %v60_v35  ;;  %vm50_vm7 = vcmp.eq.s32.totalorder %v44_v37, %v1056_v19  ;;  %vm51_vm8 = vcmp.eq.s32.totalorder %v47_v38, %v1056_v19 }
  0x9a   :  { %848 = vmatpush3.bf16.msra.mxu1 %v925_v30  ;;  %v748_v45 = vsel %vm50_vm7, 1.0, %v1015_v17  ;;  %v749_v46 = vsel %vm51_vm8, 1.0, %v1015_v17  ;;  %vm572_vm7 = vcmp.lt.s32.totalorder %v1056_v19, 48 }
  0x9b   :  { %849 = vmatprep.subr.bf16.mxu1 %v927_v36  ;;  %v61_v49 = vpack.c.bf16 %v749_v46, %v748_v45  ;;  %vm573_vm8 = vmand %vm571_vm6, %vm572_vm7 }
  0x9d   :  { %v265_v40 = vpop.permute.xlu1 %264  ;;  %v268_v41 = vpop.permute.xlu0 %267 }
  0x9e   :  { %vm275_vm9 = vcmp.eq.s32.totalorder %v265_v40, %v1056_v19  ;;  %850 = vmatpush3.bf16.msra.mxu1 %v927_v36  ;;  %vm276_vm10 = vcmp.eq.s32.totalorder %v268_v41, %v1056_v19 }
  0x9f   :  { %v766_v42 = vsel %vm275_vm9, 1.0, %v1015_v17  ;;  %v767_v43 = vsel %vm276_vm10, 1.0, %v1015_v17  ;;  %851 = vmatprep.subr.bf16.mxu1 %v929_v39 }
  0xa0   :  { %v287_v47 = vpack.c.bf16 %v767_v43, %v766_v42 }
  0xa1   :  { %v271_v48 = vpop.permute.xlu1 %270 }
  0xa2   :  { %852 = vmatpush3.bf16.msra.mxu1 %v929_v39  ;;  %865 = vmatprep.mubr.msk.bf16.mxu0 %vm128_vm4, %v287_v47  ;;  %vm277_vm11 = vcmp.eq.s32.totalorder %v271_v48, %v1056_v19  ;;  %v382_v51 = vpop.permute.xlu0 %381 }
  0xa3   :  { %869 = vmatprep.subr.bf16.mxu1 %v931_v44  ;;  %v768_v53 = vsel %vm277_vm11, 1.0, %v1015_v17  ;;  %vm392_vm13 = vcmp.eq.s32.totalorder %v382_v51, %v1056_v19 }
  0xa4   :  { %v776_v57 = vsel %vm392_vm13, 1.0, %v1015_v17 }
  0xa5   :  { %854 = vmatmul.mubr.msk.bf16.vlgmr.msra.gmra.mxu1 %vm128_vm4, %v61_v49  ;;  %v274_v52 = vpop.permute.xlu1 %273 }
  0xa6   :  { %vm278_vm12 = vcmp.eq.s32.totalorder %v274_v52, %v1056_v19  ;;  %870 = vmatpush3.bf16.msra.mxu1 %v931_v44  ;;  %v391_v59 = vpop.permute.xlu0 %390 }
  0xa7   :  { %v769_v54 = vsel %vm278_vm12, 1.0, %v1015_v17  ;;  %871 = vmatprep.subr.bf16.mxu1 %v933_v50  ;;  %vm395_vm15 = vcmp.eq.s32.totalorder %v391_v59, %v1056_v19 }
  0xa8   :  { %v288_v56 = vpack.c.bf16 %v769_v54, %v768_v53  ;;  %v779_v0 = vsel %vm395_vm15, 1.0, %v1015_v17 }
  0xaa   :  { %872 = vmatpush3.bf16.msra.mxu1 %v933_v50  ;;  %v385_v58 = vpop.permute.xlu1 %384  ;;  %866 = vmatmul.mubr.msk.bf16.vlgmr.msra.gmra.mxu0 %vm128_vm4, %v288_v56 }
  0xab   :  { %vm393_vm14 = vcmp.eq.s32.totalorder %v385_v58, %v1056_v19  ;;  %873 = vmatprep.subr.bf16.mxu1 %v934_v55  ;;  %882 = vmatpush3.bf16.msra.mxu0 %v936_v3 }
  0xac   :  { %v777_v61 = vsel %vm393_vm14, 1.0, %v1015_v17  ;;  %883 = vmatprep.subr.bf16.mxu0 %v1015_v17  ;;  %897 = vmatprep.mubr.msk.bf16.mxu0 %vm1016_vm1, %v1015_v17  ;;  %vm624_vm1 = vcmask 1041409  }
  0xad   :  { %v404_v62 = vpack.c.bf16 %v777_v61, %v776_v57 }
  0xae   :  { %874 = vmatpush3.bf16.msra.mxu1 %v934_v55  ;;  %v388_v63 = vpop.permute.xlu1 %387 }
  0xaf   :  { %vm394_vm0 = vcmp.eq.s32.totalorder %v388_v63, %v1056_v19  ;;  %875 = vmatprep.subr.bf16.mxu1 %v935_v60  ;;  %877 = vmatprep.mubr.msk.bf16.mxu1 %vm128_vm4, %v404_v62 }
  0xb0   :  { %v778_v1 = vsel %vm394_vm0, 1.0, %v1015_v17  ;;  %884 = vmatpush3.bf16.msra.mxu0 %v937_v4 }
  0xb1   :  { %v405_v2 = vpack.c.bf16 %v779_v0, %v778_v1  ;;  %885 = vmatprep.subr.bf16.mxu0 %v1015_v17 }
  0xb2   :  { %876 = vmatpush3.bf16.msra.mxu1 %v935_v60 }
  0xb4   :  { %886 = vmatpush3.bf16.msra.mxu0 %v938_v5 }
  0xb5   :  { %878 = vmatmul.mubr.msk.bf16.vlgmr.msra.gmra.mxu1 %vm128_vm4, %v405_v2  ;;  %887 = vmatprep.subr.bf16.mxu0 %v1015_v17  ;;  %vm568_vm4 = vcmp.lt.s32.totalorder %v1056_v19, 32 }
  0xb6   :  { %vm1125_vm5 = vmand %vm567_vm3, %vm568_vm4 }
  0xb8   :  { %888 = vmatpush3.bf16.msra.mxu0 %v939_v6  ;;  %v555_v6 = vshrl.u32 %v30_v18, 7 }
  0xb9   :  { %889 = vmatprep.subr.bf16.mxu0 %v1015_v17 }
  0xba   :  { %v558_v18 = vadd.s32 24, %v555_v6 }
  0xbc   :  { %890 = vmatpush3.bf16.msra.mxu0 %v940_v7  ;;  %v557_v7 = vadd.s32 16, %v555_v6 }
  0xbd   :  { %891 = vmatprep.subr.bf16.mxu0 %v1015_v17 }
  0xc0   :  { %892 = vmatpush3.bf16.msra.mxu0 %v941_v8  ;;  %v1017_v8 = vmov 15  }
  0xc1   :  { %893 = vmatprep.subr.bf16.mxu0 %v1015_v17 }
  0xc4   :  { %894 = vmatpush3.bf16.msra.mxu0 %v942_v9  ;;  %v566_v9 = vsel %vm564_vm2, 14, %v1017_v8  ;;  %vm716_vm2 = vcmask 1041408  }
  0xc5   :  { %895 = vmatprep.subr.bf16.mxu0 %v1015_v17  ;;  %v786_v17 = vld [vmem:[%s1149_s2] ss:$0 sm:$0xff] }
  0xc8   :  { %896 = vmatpush3.bf16.msra.mxu0 %v943_v10 }
 0x155   :  { %v843_v11 = vpop.f32.mrf.mxu1 }
 0x157   :  { %v169_v12 = vpop.f32.mrf.mxu1 }
 0x159   :  { %v844_v13 = vpop.f32.mrf.mxu1 }
 0x15b   :  { %v172_v14 = vpop.f32.mrf.mxu1 }
 0x165   :  { %v855_v15 = vpop.f32.mrf.mxu1 }
 0x166   :  { %v257_v23 = vadd.f32 %v855_v15, %v843_v11 }
 0x167   :  { %v248_v16 = vpop.f32.mrf.mxu1 }
 0x168   :  { %v249_v25 = vadd.f32 %v248_v16, %v169_v12  ;;  %v556_v16 = vadd.s32 8, %v555_v6 }
 0x169   :  { %v856_v21 = vpop.f32.mrf.mxu1 }
 0x16a   :  { %v867_v20 = vpop.f32.mrf.mxu0  ;;  %v260_v29 = vadd.f32 %v856_v21, %v844_v13  ;;  %v561_v21 = vand.u32 15, %v557_v7 }
 0x16b   :  { %v251_v24 = vpop.f32.mrf.mxu1  ;;  %v378_v26 = vadd.f32 %v867_v20, %v257_v23 }
 0x16c   :  { %v361_v22 = vpop.f32.mrf.mxu0  ;;  %v252_v37 = vadd.f32 %v251_v24, %v172_v14  ;;  %v570_v14 = vsel %vm1125_vm5, 13, %v566_v9 }
 0x16d   :  { %v376_v30 = vadd.f32 %v361_v22, %v249_v25  ;;  %v562_v25 = vand.u32 15, %v558_v18  ;;  %v574_v19 = vsel %vm573_vm8, 12, %v570_v14 }
 0x16e   :  { %v868_v27 = vpop.f32.mrf.mxu0  ;;  %vm577_vm12 = vcmp.le.s32.totalorder %v561_v21, %v574_v19 }
 0x16f   :  { %v379_v33 = vadd.f32 %v868_v27, %v260_v29  ;;  %v559_v27 = vand.u32 15, %v555_v6  ;;  %vm578_vm13 = vcmp.le.s32.totalorder %v562_v25, %v574_v19 }
 0x170   :  { %v364_v34 = vpop.f32.mrf.mxu0 }
 0x171   :  { %v377_v42 = vadd.f32 %v364_v34, %v252_v37  ;;  %vm575_vm14 = vcmp.le.s32.totalorder %v559_v27, %v574_v19 }
 0x175   :  { %v879_v28 = vpop.f32.mrf.mxu1 }
 0x176   :  { %v495_v31 = vadd.f32 %v879_v28, %v378_v26 }
 0x177   :  { %v478_v32 = vpop.f32.mrf.mxu1 }
 0x178   :  { %v1109_v35 = vadd.f32 %v786_v17, %v495_v31  ;;  %v493_v36 = vadd.f32 %v478_v32, %v376_v30 }
 0x179   :  { %v880_v38 = vpop.f32.mrf.mxu1 }
 0x17a   :  { %v508_v39 = vmin.f32 %v1109_v35, 20.0  ;;  %v1112_v40 = vadd.f32 %v786_v17, %v493_v36  ;;  %v496_v41 = vadd.f32 %v880_v38, %v379_v33  ;;  %vm544_vm9 = vcmp.gt.f32.partialorder %v1109_v35, 20.0 }
 0x17b   :  { %v481_v43 = vpop.f32.mrf.mxu1 }
 0x17c   :  { %v514_v44 = vmul.f32 1.442695, %v508_v39  ;;  %v506_v45 = vmin.f32 %v1112_v40, 20.0  ;;  %v1115_v46 = vadd.f32 %v786_v17, %v496_v41  ;;  %v494_v47 = vadd.f32 %v481_v43, %v377_v42 }
 0x17d   :  { %vm542_vm10 = vcmp.gt.f32.partialorder %v1112_v40, 20.0 }
 0x17e   :  { %944 = vpow2.f32 %v514_v44  ;;  %v510_v48 = vmul.f32 1.442695, %v506_v45  ;;  %v509_v49 = vmin.f32 %v1115_v46, 20.0  ;;  %v1118_v50 = vadd.f32 %v786_v17, %v494_v47 }
 0x17f   :  { %v560_v17 = vand.u32 15, %v556_v16  ;;  %vm545_vm11 = vcmp.gt.f32.partialorder %v1115_v46, 20.0 }
 0x180   :  { %946 = vpow2.f32 %v510_v48  ;;  %v516_v51 = vmul.f32 1.442695, %v509_v49  ;;  %v507_v52 = vmin.f32 %v1118_v50, 20.0  ;;  %vm543_vm15 = vcmp.gt.f32.partialorder %v1118_v50, 20.0 }
 0x181   :  { %vm576_vm0 = vcmp.le.s32.totalorder %v560_v17, %v574_v19 }
 0x182   :  { %948 = vpow2.f32 %v516_v51  ;;  %v512_v53 = vmul.f32 1.442695, %v507_v52 }
 0x184   :  { %950 = vpow2.f32 %v512_v53 }
 0x18b   :  { %v945_v54 = vpop.eup %944 }
 0x18c   :  { %v520_v55 = vadd.f32 1.0, %v945_v54 }
 0x18d   :  { %v947_v56 = vpop.eup %946 }
 0x18e   :  { %v524_v57 = vmul.f32 %v520_v55, %v520_v55  ;;  %v518_v58 = vadd.f32 1.0, %v947_v56 }
 0x18f   :  { %v949_v59 = vpop.eup %948 }
 0x190   :  { %v532_v60 = vadd.f32 1.0, %v524_v57  ;;  %v522_v61 = vmul.f32 %v518_v58, %v518_v58  ;;  %v521_v62 = vadd.f32 1.0, %v949_v59  ;;  %v789_v11 = vadd.f32 -1.0, %v524_v57 }
 0x191   :  { %v951_v63 = vpop.eup %950 }
 0x192   :  { %952 = vrcp.f32 %v532_v60  ;;  %v530_v0 = vadd.f32 1.0, %v522_v61  ;;  %v525_v1 = vmul.f32 %v521_v62, %v521_v62  ;;  %v519_v2 = vadd.f32 1.0, %v951_v63  ;;  %v791_v63 = vld [vmem:[%s1149_s2 + $0x1] ss:$0 sm:$0xff]  ;;  %s1018_s2 = smov [#allocation5]  }
 0x193   :  { %v787_v15 = vadd.f32 -1.0, %v522_v61  ;;  %s737_s29 = sshll.u32 %s1018_s2, 4  ;;  %s738_s29 = int_to_ptr.vmem [resolvable:$true] %s737_s29 }
 0x194   :  { %954 = vrcp.f32 %v530_v0  ;;  %v533_v3 = vadd.f32 1.0, %v525_v1  ;;  %v523_v4 = vmul.f32 %v519_v2, %v519_v2  ;;  %v790_v24 = vadd.f32 -1.0, %v525_v1  ;;  %s984_s30 = scalar_lea.vmem %s738_s29, 32  ;;  %p989_p6 = scmp.lt.s32.totalorder %s738_s29, %s738_s29 }
 0x195   :  { %p985_p5 = scmp.ne.s32.totalorder %s738_s29, %s984_s30  ;;  %p990_p7 = scmp.lt.s32.totalorder %s984_s30, %s984_s30 }
 0x196   :  { %956 = vrcp.f32 %v533_v3  ;;  %v531_v5 = vadd.f32 1.0, %v523_v4  ;;  %v788_v31 = vadd.f32 -1.0, %v523_v4 }
 0x197   :  { %p991_p8 = por %p990_p7, %p989_p6 }
 0x198   :  { %958 = vrcp.f32 %v531_v5 }
 0x199   :  { %p992_p9 = pnand %p991_p8, %p985_p5 }
 0x19f   :  { %v953_v12 = vpop.eup %952 }
 0x1a0   :  { %v540_v13 = vmul.f32 %v953_v12, %v789_v11 }
 0x1a1   :  { %v955_v20 = vpop.eup %954 }
 0x1a2   :  { %v548_v22 = vsel %vm544_vm9, 1.0, %v540_v13  ;;  %v538_v23 = vmul.f32 %v955_v20, %v787_v15 }
 0x1a3   :  { %v957_v26 = vpop.eup %956  ;;  %v552_v29 = vmul.f32 %v548_v22, %v1109_v35 }
 0x1a4   :  { %v541_v28 = vmul.f32 %v957_v26, %v790_v24  ;;  %v546_v30 = vsel %vm542_vm10, 1.0, %v538_v23 }
 0x1a5   :  { %v959_v32 = vpop.eup %958  ;;  %v550_v37 = vmul.f32 %v546_v30, %v1112_v40  ;;  %v581_v38 = vsel %vm577_vm12, %v552_v29, -1e+30 }
 0x1a6   :  { %v549_v33 = vsel %vm545_vm11, 1.0, %v541_v28  ;;  %v539_v36 = vmul.f32 %v959_v32, %v788_v31 }
 0x1a7   :  { %v553_v34 = vmul.f32 %v549_v33, %v1115_v46  ;;  %v579_v43 = vsel %vm575_vm14, %v550_v37, -1e+30 }
 0x1a8   :  { %v547_v41 = vsel %vm543_vm15, 1.0, %v539_v36 }
 0x1a9   :  { %v582_v39 = vsel %vm578_vm13, %v553_v34, -1e+30  ;;  %v551_v42 = vmul.f32 %v547_v41, %v1118_v50 }
 0x1aa   :  { %v590_v35 = vmax.f32 %v581_v38, %v582_v39 }
 0x1ab   :  { %v580_v45 = vsel %vm576_vm0, %v551_v42, -1e+30 }
 0x1ac   :  { %v591_v44 = vrot.slane %v590_v35, 4  ;;  %v583_v47 = vmax.f32 %v579_v43, %v580_v45 }
 0x1ae   :  { %v592_v48 = vmax.f32 %v590_v35, %v591_v44  ;;  %v584_v49 = vrot.slane %v583_v47, 4 }
 0x1b0   :  { %v593_v46 = vrot.slane %v592_v48, 2  ;;  %v585_v51 = vmax.f32 %v583_v47, %v584_v49 }
 0x1b2   :  { %v594_v52 = vmax.f32 %v592_v48, %v593_v46  ;;  %v586_v40 = vrot.slane %v585_v51, 2 }
 0x1b4   :  { %v595_v53 = vrot.slane %v594_v52, 1  ;;  %v587_v54 = vmax.f32 %v585_v51, %v586_v40 }
 0x1b6   :  { %v596_v55 = vmax.f32 %v594_v52, %v595_v53  ;;  %v588_v56 = vrot.slane %v587_v54, 1 }
 0x1b8   :  { %v589_v57 = vmax.f32 %v587_v54, %v588_v56  ;;  %v598_v58 = vpack.c.bf16 %v596_v55, %v596_v55 }
 0x1ba   :  { %v597_v59 = vpack.c.bf16 %v589_v57, %v589_v57  ;;  %v623_v50 = vunpack.c.l.b16 %v598_v58 }
 0x1bc   :  { %v622_v60 = vunpack.c.l.b16 %v597_v59 }
 0x1be   :  { %v625_v61 = vsel %vm624_vm1, %v623_v50, %v622_v60 }
 0x1bf   :  { %v626_v62 = vpack.c.b16 %v625_v61, %v625_v61 }
 0x1c1   :  { %898 = vmatmul.mubr.bf16.vlgmr.msra.gmra.mxu0 %v626_v62 }
 0x281   :  { %v710_v0 = vpop.f32.mrf.mxu0 }
 0x282   :  { %v711_v1 = vadd.f32 %v791_v63, %v710_v0 }
 0x283   :  { %v899_v2 = vpop.f32.mrf.mxu0 }
 0x284   :  { %v717_v3 = vsel %vm716_vm2, %v711_v1, -inf }
 0x285   :  { %718 = vmax.xlane.f32.xlu1 %v717_v3  ;;  %v713_v4 = vpop.f32.mrf.mxu0 }
 0x287   :  { %v900_v5 = vpop.f32.mrf.mxu0 }
 0x30e   :  { %v719_v6 = vpop.xlane.xlu1 %718 }
 0x30f   :  { %v720_v7 = vsub.f32 %v711_v1, %v719_v6 }
 0x311   :  { %v721_v8 = vmul.f32 1.442695, %v720_v7 }
 0x313   :  { %960 = vpow2.f32 %v721_v8 }
 0x320   :  { %v961_v9 = vpop.eup %960 }
 0x321   :  { %v723_v10 = vsel %vm716_vm2, %v961_v9, 0.0 }
 0x322   :  { %724 = vadd.xlane.f32.xlu0 %v723_v10 }
 0x3ab   :  { %v725_v11 = vpop.xlane.xlu0 %724 }
 0x3ac   :  { %962 = vlog2.f32 %v725_v11 }
 0x3b9   :  { %v963_v18 = vpop.eup %962 }
 0x3ba   :  { %v727_v12 = vmul.f32 0.6931472, %v963_v18 }
 0x3bc   :  { %v728_v13 = vadd.f32 %v727_v12, %v719_v6 }
 0x3be   :  { %v729_v14 = vsub.f32 %v711_v1, %v728_v13 }
 0x3c0   :  { %730 = vst [vmem:[#allocation5] sm:$0x3] %v729_v14 }
 0x3c1   :  { %995 = shalt.err (!%p992_p9)
}
 0x3c2   :  { %740 = dma.vmem_to_hbm [thread:$0]  %s738_s29, 32, %s1150_s3, [#allocation4]  }
 0x3c3   :  { %1006 = dma.done.wait [#allocation4], 32  }
 0x3c4   :  { %1007 = vsyncadd [#allocation4], 4294967264 }
 0x3c5   :  { %744 = vsyncpa [#allocation3], 1 }
 0x3c6   :  { %745 = vsyncpa [#allocation4], 1 }

</bundles_post_ra>
